<compile_context>
chip_gen: v5e
topology: v5e:2x2
jax: 0.10.0
libtpu: 0.0.40
codegen_flags: <defaults>
</compile_context>

<pallas_src>
import jax
import jax.numpy as jnp
from jax import lax
from jax.experimental import pallas as pl
from jax.experimental.pallas import tpu as pltpu


def _round_up(a, m):
    return ((a + m - 1) // m) * m


def _choose_batch_tile(batch, tb):
    """Round the requested tile to lane granularity (128).

    If the batch fits in one tile, use a single full-array block (any size is legal
    when the block equals the full dim). Otherwise cap the tile so the grid has at
    least 4 steps, so v7x's two TensorCores both get work under 'parallel' semantics.
    """
    tb = max(128, _round_up(tb, 128))
    if batch <= tb:
        return batch
    per4 = max(128, _round_up((batch + 3) // 4, 128))
    return min(tb, per4)


def mlp_kernel(x_ref, w1_ref, b1_ref, w2_ref, b2_ref, w3_ref, b3_ref, o_ref):
    # x tile: (tb, D_in) row-major straight from HBM (natural layout, dense DMA).
    x = x_ref[...]                                                   # (tb, D_in) f32

    # Layer 1: h1.T = W1 @ x.T + b1  -> (8, tb), batch on the 128-lane axis.
    # NT matmul (contract both minor dims) -- same dot_general form as q @ k.T.
    h1 = lax.dot_general(
        w1_ref[...], x, (((1,), (1,)), ((), ())),
        preferred_element_type=jnp.float32) + b1_ref[...]
    h1 = jnp.maximum(h1, 0.0)

    # Layer 2: h2.T = W2 @ h1.T + b2 -> (6, tb)
    h2 = jnp.dot(w2_ref[...], h1, preferred_element_type=jnp.float32) + b2_ref[...]
    h2 = jnp.maximum(h2, 0.0)

    # Layer 3 (logits, no activation): (D_out, tb), lane-dense store.
    logits = jnp.dot(w3_ref[...], h2, preferred_element_type=jnp.float32) + b3_ref[...]
    o_ref[...] = logits.astype(o_ref.dtype)


def distance_network_forward(x, params, *, tb=8192):
    """x: (B, D_in) float32. params: torch-shaped f32 weights/biases.
    Returns logits (B, D_out) float32.

    tb: rows of x per grid step. Default 8192 (~1 MiB of f32 x per step) amortizes the
    per-step overhead on v5e/v6e; sweep towards 16-32K on v7x. Per-step VMEM
    (double-buffered x + lane-dense output + compiler scratch) is ~4 MiB at tb=8192,
    far under the 32 MiB scoped default on all generations.
    """
    w1, b1, w2, b2, w3, b3 = (params[k] for k in ("w1", "b1", "w2", "b2", "w3", "b3"))
    B, D_in = x.shape
    D_out = w3.shape[0]

    tb_eff = _choose_batch_tile(B, tb)
    num_tiles = pl.cdiv(B, tb_eff)          # ragged last block handled by Pallas masking

    const = lambda i: (0, 0)  # weights/biases: same block every step -> VMEM-resident

    out_t = pl.pallas_call(
        mlp_kernel,
        out_shape=jax.ShapeDtypeStruct((D_out, B), jnp.float32),
        grid_spec=pltpu.PrefetchScalarGridSpec(
            num_scalar_prefetch=0,
            grid=(num_tiles,),
            in_specs=[
                pl.BlockSpec((tb_eff, D_in), lambda i: (i, 0)),  # x: batch-tiled rows
                pl.BlockSpec(w1.shape, const),                   # W1 (8, D_in)
                pl.BlockSpec(b1.shape, const),                   # b1 (8, 1)
                pl.BlockSpec(w2.shape, const),                   # W2 (6, 8)
                pl.BlockSpec(b2.shape, const),                   # b2 (6, 1)
                pl.BlockSpec(w3.shape, const),                   # W3 (D_out, 6)
                pl.BlockSpec(b3.shape, const),                   # b3 (D_out, 1)
            ],
            # Lane-dense output: batch on the 128-lane axis, dense unmasked stores.
            out_specs=pl.BlockSpec((D_out, tb_eff), lambda i: (0, i)),
        ),
        compiler_params=pltpu.CompilerParams(
            # Batch axis is independent per step -> v7x can shard grid steps across
            # its 2 TensorCores.
            dimension_semantics=("parallel",),
        ),
    )(x, w1, b1, w2, b2, w3, b3)

    # Tiny (D_out, B) -> (B, D_out) transpose to preserve the module's output layout.
    return out_t.T


def init_params(key, input_dim, output_dim):
    """PyTorch-style init U(-1/sqrt(fan_in), 1/sqrt(fan_in)); torch-shaped tensors:
    weights (out_features, in_features), biases stored as (out_features, 1)."""
    dims = [(input_dim, 8), (8, 6), (6, output_dim)]
    params = {}
    for idx, (fin, fout) in enumerate(dims, start=1):
        key, kw, kb = jax.random.split(key, 3)
        bound = 1.0 / float(fin) ** 0.5
        params[f"w{idx}"] = jax.random.uniform(
            kw, (fout, fin), jnp.float32, minval=-bound, maxval=bound)
        params[f"b{idx}"] = jax.random.uniform(
            kb, (fout, 1), jnp.float32, minval=-bound, maxval=bound)
    return params


def reference_forward(x, params):
    """Plain-JAX f32 reference (torch-equivalent math)."""
    hp = lax.Precision.HIGHEST
    w1, w2, w3 = params["w1"], params["w2"], params["w3"]
    b1, b2, b3 = params["b1"], params["b2"], params["b3"]
    h1 = jnp.maximum(jnp.dot(x, w1.T, precision=hp) + b1[:, 0], 0.0)
    h2 = jnp.maximum(jnp.dot(h1, w2.T, precision=hp) + b2[:, 0], 0.0)
    return jnp.dot(h2, w3.T, precision=hp) + b3[:, 0]


if __name__ == "__main__":
    key = jax.random.PRNGKey(0)
    input_dim, output_dim = 32, 4
    kx, kp = jax.random.split(key)
    params = init_params(kp, input_dim, output_dim)

    # Case 1: tiny batch -> single full-array block (exercises the B <= tb path).
    x_small = jax.random.normal(kx, (20, input_dim), jnp.float32)
    out_small = jax.block_until_ready(distance_network_forward(x_small, params))
    ref_small = reference_forward(x_small, params)
    assert out_small.shape == (20, output_dim), out_small.shape
    assert jnp.allclose(out_small, ref_small, atol=1e-3, rtol=1e-3), \
        "small-batch mismatch vs JAX reference"

    # Case 2: multi-tile grid with a ragged last block (300 = 2*128 + 44):
    # exercises cdiv grid + masked writeback without any wrapper-side padding.
    x_big = jax.random.normal(jax.random.fold_in(kx, 1), (300, input_dim), jnp.float32)
    out_big = jax.block_until_ready(distance_network_forward(x_big, params, tb=128))
    ref_big = reference_forward(x_big, params)
    assert out_big.shape == (300, output_dim), out_big.shape
    assert jnp.allclose(out_big, ref_big, atol=1e-3, rtol=1e-3), \
        "ragged-batch mismatch vs JAX reference"

    print("KERNEL_OK")
</pallas_src>

<mosaic_0001>
module attributes {stable_mosaic.version = 11 : i64} {
  func.func @mlp_kernel(%arg0: i32, %arg1: memref<20x32xf32, #tpu.memory_space<vmem>>, %arg2: memref<8x32xf32, #tpu.memory_space<vmem>>, %arg3: memref<8x1xf32, #tpu.memory_space<vmem>>, %arg4: memref<6x8xf32, #tpu.memory_space<vmem>>, %arg5: memref<6x1xf32, #tpu.memory_space<vmem>>, %arg6: memref<4x6xf32, #tpu.memory_space<vmem>>, %arg7: memref<4x1xf32, #tpu.memory_space<vmem>>, %arg8: memref<4x20xf32, #tpu.memory_space<vmem>>) attributes {dimension_semantics = [#tpu.dimension_semantics<parallel>], iteration_bounds = array<i64: 1>, scalar_prefetch = 0 : i64, scratch_operands = 0 : i64, tpu.core_type = #tpu.core_type<tc>, window_params = [{transform_indices = @transform_0, window_bounds = array<i64: 20, 32>}, {pipeline_mode = #tpu.pipeline_mode<synchronous>, transform_indices = @transform_1, window_bounds = array<i64: 8, 32>}, {pipeline_mode = #tpu.pipeline_mode<synchronous>, transform_indices = @transform_2, window_bounds = array<i64: 8, 1>}, {pipeline_mode = #tpu.pipeline_mode<synchronous>, transform_indices = @transform_3, window_bounds = array<i64: 6, 8>}, {pipeline_mode = #tpu.pipeline_mode<synchronous>, transform_indices = @transform_4, window_bounds = array<i64: 6, 1>}, {pipeline_mode = #tpu.pipeline_mode<synchronous>, transform_indices = @transform_5, window_bounds = array<i64: 4, 6>}, {pipeline_mode = #tpu.pipeline_mode<synchronous>, transform_indices = @transform_6, window_bounds = array<i64: 4, 1>}, {transform_indices = @transform_7, window_bounds = array<i64: 4, 20>}]} {
    %c0 = arith.constant 0 : index
    %c0_0 = arith.constant 0 : index
    %0 = vector.load %arg1[%c0, %c0_0] : memref<20x32xf32, #tpu.memory_space<vmem>>, vector<20x32xf32>
    %c0_1 = arith.constant 0 : index
    %c0_2 = arith.constant 0 : index
    %1 = vector.load %arg2[%c0_1, %c0_2] : memref<8x32xf32, #tpu.memory_space<vmem>>, vector<8x32xf32>
    %cst = arith.constant dense<0.000000e+00> : vector<8x20xf32>
    %2 = tpu.matmul %1, %0, %cst {dimension_numbers = #tpu.dot_dimension_numbers<[1], [1], [0], [0], [0, 0, 1, 0], [], []>} : vector<8x32xf32>, vector<20x32xf32>, vector<8x20xf32> -> vector<8x20xf32>
    %c0_3 = arith.constant 0 : index
    %c0_4 = arith.constant 0 : index
    %3 = vector.load %arg3[%c0_3, %c0_4] : memref<8x1xf32, #tpu.memory_space<vmem>>, vector<8x1xf32>
    %4 = vector.broadcast %3 : vector<8x1xf32> to vector<8x20xf32>
    %5 = arith.addf %2, %4 : vector<8x20xf32>
    %cst_5 = arith.constant 0.000000e+00 : f32
    %6 = vector.broadcast %cst_5 : f32 to vector<8x20xf32>
    %7 = arith.maximumf %5, %6 : vector<8x20xf32>
    %c0_6 = arith.constant 0 : index
    %c0_7 = arith.constant 0 : index
    %8 = vector.load %arg4[%c0_6, %c0_7] : memref<6x8xf32, #tpu.memory_space<vmem>>, vector<6x8xf32>
    %cst_8 = arith.constant dense<0.000000e+00> : vector<6x20xf32>
    %9 = tpu.matmul %8, %7, %cst_8 {dimension_numbers = #tpu.dot_dimension_numbers<[1], [0], [0], [1], [0, 0, 1, 1], [], []>} : vector<6x8xf32>, vector<8x20xf32>, vector<6x20xf32> -> vector<6x20xf32>
    %c0_9 = arith.constant 0 : index
    %c0_10 = arith.constant 0 : index
    %10 = vector.load %arg5[%c0_9, %c0_10] : memref<6x1xf32, #tpu.memory_space<vmem>>, vector<6x1xf32>
    %11 = vector.broadcast %10 : vector<6x1xf32> to vector<6x20xf32>
    %12 = arith.addf %9, %11 : vector<6x20xf32>
    %cst_11 = arith.constant 0.000000e+00 : f32
    %13 = vector.broadcast %cst_11 : f32 to vector<6x20xf32>
    %14 = arith.maximumf %12, %13 : vector<6x20xf32>
    %c0_12 = arith.constant 0 : index
    %c0_13 = arith.constant 0 : index
    %15 = vector.load %arg6[%c0_12, %c0_13] : memref<4x6xf32, #tpu.memory_space<vmem>>, vector<4x6xf32>
    %cst_14 = arith.constant dense<0.000000e+00> : vector<4x20xf32>
    %16 = tpu.matmul %15, %14, %cst_14 {dimension_numbers = #tpu.dot_dimension_numbers<[1], [0], [0], [1], [0, 0, 1, 1], [], []>} : vector<4x6xf32>, vector<6x20xf32>, vector<4x20xf32> -> vector<4x20xf32>
    %c0_15 = arith.constant 0 : index
    %c0_16 = arith.constant 0 : index
    %17 = vector.load %arg7[%c0_15, %c0_16] : memref<4x1xf32, #tpu.memory_space<vmem>>, vector<4x1xf32>
    %18 = vector.broadcast %17 : vector<4x1xf32> to vector<4x20xf32>
    %19 = arith.addf %16, %18 : vector<4x20xf32>
    %c0_17 = arith.constant 0 : index
    %c0_18 = arith.constant 0 : index
    %20 = vector.load %arg8[%c0_17, %c0_18] : memref<4x20xf32, #tpu.memory_space<vmem>>, vector<4x20xf32>
    tpu.vector_store %arg8[%c0_17, %c0_18], %19 {strides = array<i32>} : memref<4x20xf32, #tpu.memory_space<vmem>>, vector<4x20xf32>,
    return
  }
  func.func @transform_0(%arg0: i32) -> (i32, i32) {
    %c0_i32 = arith.constant 0 : i32
    %c0_i32_0 = arith.constant 0 : i32
    return %arg0, %c0_i32 : i32, i32
  }
  func.func @transform_1(%arg0: i32) -> (i32, i32) {
    %c0_i32 = arith.constant 0 : i32
    %c0_i32_0 = arith.constant 0 : i32
    %c0_i32_1 = arith.constant 0 : i32
    return %c0_i32, %c0_i32_0 : i32, i32
  }
  func.func @transform_2(%arg0: i32) -> (i32, i32) {
    %c0_i32 = arith.constant 0 : i32
    %c0_i32_0 = arith.constant 0 : i32
    %c0_i32_1 = arith.constant 0 : i32
    return %c0_i32, %c0_i32_0 : i32, i32
  }
  func.func @transform_3(%arg0: i32) -> (i32, i32) {
    %c0_i32 = arith.constant 0 : i32
    %c0_i32_0 = arith.constant 0 : i32
    %c0_i32_1 = arith.constant 0 : i32
    return %c0_i32, %c0_i32_0 : i32, i32
  }
  func.func @transform_4(%arg0: i32) -> (i32, i32) {
    %c0_i32 = arith.constant 0 : i32
    %c0_i32_0 = arith.constant 0 : i32
    %c0_i32_1 = arith.constant 0 : i32
    return %c0_i32, %c0_i32_0 : i32, i32
  }
  func.func @transform_5(%arg0: i32) -> (i32, i32) {
    %c0_i32 = arith.constant 0 : i32
    %c0_i32_0 = arith.constant 0 : i32
    %c0_i32_1 = arith.constant 0 : i32
    return %c0_i32, %c0_i32_0 : i32, i32
  }
  func.func @transform_6(%arg0: i32) -> (i32, i32) {
    %c0_i32 = arith.constant 0 : i32
    %c0_i32_0 = arith.constant 0 : i32
    %c0_i32_1 = arith.constant 0 : i32
    return %c0_i32, %c0_i32_0 : i32, i32
  }
  func.func @transform_7(%arg0: i32) -> (i32, i32) {
    %c0_i32 = arith.constant 0 : i32
    %c0_i32_0 = arith.constant 0 : i32
    return %c0_i32, %arg0 : i32, i32
  }
}

</mosaic_0001>

<bundles_post_ra>
// kernel: tpu_custom_call.1
= control target key start
LH: loop header
LB: loop body
LE: loop exit
PB: predicated region body
PF: predicated region fallthrough
CT: control target
= control target key end

     0   :  { %12 = vsyncpa [#allocation3], 0  ;;  %s308_s0 = inlined_call_operand.hbm [shape: f32[20,32], index: 0, kind: input, shape index: {}]   ;;  %s309_s1 = inlined_call_operand.vmem [shape: f32[8,32], index: 1, kind: input, shape index: {}]   ;;  %s310_s2 = inlined_call_operand.vmem [shape: f32[8,1], index: 2, kind: input, shape index: {}]   ;;  %s311_s3 = inlined_call_operand.vmem [shape: f32[6,8], index: 3, kind: input, shape index: {}]   ;;  %s312_s4 = inlined_call_operand.vmem [shape: f32[6,1], index: 4, kind: input, shape index: {}]   ;;  %s313_s5 = inlined_call_operand.vmem [shape: f32[4,6], index: 5, kind: input, shape index: {}]   ;;  %s314_s6 = inlined_call_operand.vmem [shape: f32[4,1], index: 6, kind: input, shape index: {}]   ;;  %s315_s7 = inlined_call_operand.hbm [shape: f32[4,20], index: 7, kind: output, shape index: {}]  }
   0x1   :  { %13 = vsyncpa [#allocation4], 0  ;;  %s18_s26 = sshll.u32 %s308_s0, 4  ;;  %s239_s27 = smov [#allocation2]   ;;  %s19_s26 = int_to_ptr.hbm [resolvable:$true] %s18_s26 }
   0x2   :  { %s20_s28 = sshll.u32 %s239_s27, 4  ;;  %s240_s29 = smov 128   ;;  %s21_s28 = int_to_ptr.vmem [resolvable:$true] %s20_s28 }
   0x3   :  { %s241_s30 = smov 8  }
   0x4   :  { %26 = dma.hbm_to_vmem [thread:$0]  %s19_s26, 384, %s21_s28, [#allocation3], %s240_s29, %s240_s29, %s241_s30  }
   0x5   :  { %235 = dma.done.wait [#allocation3], 384  }
   0x6   :  { %236 = vsyncadd [#allocation3], 4294966912  ;;  %v242_v0 = vmov 0   ;;  %vm53_vm0 = vcmask 261120   ;;  %v45_v1 = vld [vmem:[#allocation2 + $0x10] sm:$0xf] }
   0x7   :  { %185 = vset.pattern.permute.xlu0 %v242_v0  ;;  %186 = vset.pattern.permute.xlu1 %v242_v0  ;;  %v47_v2 = vld [vmem:[%s310_s2] sm:$0xff]  ;;  %v44_v3 = vld [vmem:[#allocation2 + $0x8] sm:$0xff]  ;;  %vm94_vm1 = vcmask 64512   ;;  %vm130_vm2 = vcmask 1045504   ;;  %vm126_vm3 = vcmask 48128   ;;  %vm154_vm4 = vcmask 158720  }
   0x8   :  { %173 = vmatpush.xpose.msk.msra.mxu0 %vm53_vm0, %v45_v1  ;;  %50 = vperm.xlu0 %185, %v47_v2   ;;  %v43_v4 = vld [vmem:[#allocation2] sm:$0xff] }
   0x9   :  { %v88_v5 = vld [vmem:[%s312_s4] sm:$0x3f] }
   0xa   :  { %v46_v6 = vld [vmem:[%s309_s1] sm:$0xff] }
   0xb   :  { %v87_v11 = vld [vmem:[%s311_s3] sm:$0x3f]  ;;  %s243_s3 = smov [#allocation5]  }
   0xc   :  { %174 = vmatpush.xpose.msk.msra.mxu0 %vm53_vm0, %v44_v3  ;;  %v120_v12 = vld [vmem:[%s314_s6] sm:$0xf]  ;;  %s161_s16 = sshll.u32 %s243_s3, 4  ;;  %s163_s6 = sshll.u32 %s315_s7, 4  ;;  %s162_s16 = int_to_ptr.vmem [resolvable:$true] %s161_s16  ;;  %s164_s6 = int_to_ptr.hbm [resolvable:$true] %s163_s6 }
   0xd   :  { %123 = vperm.xlu1 %186, %v120_v12   ;;  %v119_v17 = vld [vmem:[%s313_s5] sm:$0xf] }
  0x10   :  { %175 = vmatpush.xpose.msk.msra.mxu0 %vm53_vm0, %v43_v4  ;;  %91 = vperm.xlu0 %185, %v88_v5  }
  0x13   :  { %176 = vmatmul.msk.f32.vlgmr.msra.gmra.mxu0 %vm53_vm0, %v46_v6 }
  0x7a   :  { %v51_v7 = vpop.permute.xlu0 %50 }
  0x7f   :  { %v124_v18 = vpop.permute.xlu1 %123 }
  0x82   :  { %v92_v13 = vpop.permute.xlu0 %91 }
  0x90   :  { %v83_v8 = vpop.f32.mrf.mxu0 }
  0x91   :  { %v84_v9 = vadd.f32 %v83_v8, %v51_v7 }
  0x93   :  { %v86_v10 = vmax.f32 %v84_v9, 0.0 }
  0x95   :  { %113 = vmatpush.msra.mxu1 %v86_v10 }
  0x96   :  { %177 = vmatmul.msk.f32.vlgmr.msra.gmra.mxu1 %vm94_vm1, %v87_v11 }
 0x113   :  { %v115_v14 = vpop.f32.mrf.mxu1 }
 0x114   :  { %v116_v15 = vadd.f32 %v115_v14, %v92_v13 }
 0x116   :  { %v118_v16 = vmax.f32 %v116_v15, 0.0 }
 0x118   :  { %178 = vmatpush.msk.msra.mxu2 %vm130_vm2, %v118_v16 }
 0x119   :  { %179 = vmatmul.msk.f32.vlgmr.msra.gmra.mxu2 %vm126_vm3, %v119_v17 }
 0x19c   :  { %v151_v19 = vpop.f32.mrf.mxu2 }
 0x19d   :  { %v152_v20 = vadd.f32 %v151_v19, %v124_v18 }
 0x19f   :  { %155 = vst.msk [vmem:[#allocation5] sm:$0xf] %vm154_vm4, %v152_v20 }
 0x1a0   :  { %166 = dma.vmem_to_hbm [thread:$0]  %s162_s16, 64, %s164_s6, [#allocation4]  }
 0x1a1   :  { %237 = dma.done.wait [#allocation4], 64  }
 0x1a2   :  { %238 = vsyncadd [#allocation4], 4294967232 }
 0x1a3   :  { %171 = vsyncpa [#allocation3], 1 }
 0x1a4   :  { %172 = vsyncpa [#allocation4], 1 }

</bundles_post_ra>
